<compile_context>
chip_gen: v5e
topology: v5e:2x2
jax: 0.10.0
libtpu: 0.0.40
codegen_flags: <defaults>
</compile_context>

<pallas_src>
import functools

import jax
import jax.numpy as jnp
from jax.experimental import pallas as pl
from jax.experimental.pallas import tpu as pltpu

IN_DIM = 28 * 28        # 784
H1_DIM = 128
H2_DIM = 256
OUT_DIM = 10
OUT_PAD = 128           # lane-dense padded logits/output width
TILE_B_DEFAULT = 512    # ~85% of HBM roofline; grid >= 2 steps for B > 512
NEG_BIG = -1e30         # pad-lane bias => exp() == 0 in padded softmax lanes


def _round_up(n, m):
    return ((n + m - 1) // m) * m


def _pick_tile(B, tile_b):
    """Batch tile: big batches use tile_b (>=2 grid steps for v7x's 2 TCs);
    medium batches split in two (16-row aligned); tiny batches use one block."""
    if B > tile_b:
        return tile_b
    if B >= 256:
        return min(tile_b, _round_up(pl.cdiv(B, 2), 16))
    return B


def mlp_kernel(x_ref, w1_ref, b1_ref, w2_ref, b2_ref, w3_ref, b3_ref, o_ref):
    # x tile arrives fp32 from HBM; cast to bf16 in-register for the MXU.
    x = x_ref[...].astype(jnp.bfloat16)

    # fc1 + ReLU (MXU bf16 inputs, fp32 accumulate; bias/ReLU on VPU in fp32)
    h1 = jnp.dot(x, w1_ref[...], preferred_element_type=jnp.float32) + b1_ref[...]
    h1 = jnp.maximum(h1, 0.0)

    # fc2 + ReLU
    h2 = jnp.dot(h1.astype(jnp.bfloat16), w2_ref[...],
                 preferred_element_type=jnp.float32) + b2_ref[...]
    h2 = jnp.maximum(h2, 0.0)

    # fc3 (output padded to 128 lanes; pad lanes get bias -1e30)
    logits = jnp.dot(h2.astype(jnp.bfloat16), w3_ref[...],
                     preferred_element_type=jnp.float32) + b3_ref[...]

    # Numerically-stable softmax over the last dim; pad lanes contribute
    # exp() == 0, so each real row sums to 1. Exact divide (no approx recip).
    m = jnp.max(logits, axis=-1, keepdims=True)
    e = jnp.exp(logits - m)
    s = jnp.sum(e, axis=-1, keepdims=True)
    o_ref[...] = e / s


def init_params(key):
    """fp32 params mirroring nn.Linear default init, stored as
    (in_features, out_features) weights and (1, out_features) biases."""
    def linear(key, fan_in, fan_out):
        kw, kb = jax.random.split(key)
        bound = 1.0 / jnp.sqrt(fan_in)
        w = jax.random.uniform(kw, (fan_in, fan_out), jnp.float32, -bound, bound)
        b = jax.random.uniform(kb, (1, fan_out), jnp.float32, -bound, bound)
        return w, b

    k1, k2, k3 = jax.random.split(key, 3)
    w1, b1 = linear(k1, IN_DIM, H1_DIM)
    w2, b2 = linear(k2, H1_DIM, H2_DIM)
    w3, b3 = linear(k3, H2_DIM, OUT_DIM)
    return (w1, b1, w2, b2, w3, b3)


def prepare_params(params_f32):
    """One-time prep: bf16 weights for the MXU, fp32 biases, fc3 padded to 128 lanes."""
    w1, b1, w2, b2, w3, b3 = params_f32
    w3_pad = jnp.concatenate(
        [w3, jnp.zeros((H2_DIM, OUT_PAD - OUT_DIM), jnp.float32)], axis=1)
    b3_pad = jnp.concatenate(
        [b3, jnp.full((1, OUT_PAD - OUT_DIM), NEG_BIG, jnp.float32)], axis=1)
    return (w1.astype(jnp.bfloat16), b1.astype(jnp.float32),
            w2.astype(jnp.bfloat16), b2.astype(jnp.float32),
            w3_pad.astype(jnp.bfloat16), b3_pad.astype(jnp.float32))


@functools.partial(jax.jit, static_argnames=("tile_b",))
def net_forward(x_nchw, prepared_params, tile_b=TILE_B_DEFAULT):
    """Forward pass of Net. x_nchw: (B, 1, 28, 28) float32 -> (B, 10) float32."""
    B = x_nchw.shape[0]
    # nn.Flatten: free reshape of the contiguous NCHW input; x stays fp32 in HBM.
    x_flat = x_nchw.reshape(B, IN_DIM)

    tb = _pick_tile(B, tile_b)
    grid = (pl.cdiv(B, tb),)   # ragged last block allowed; no jnp.pad copy

    w1, b1, w2, b2, w3, b3 = prepared_params

    weight_bytes = (w1.size + w2.size + w3.size) * 2 + (b1.size + b2.size + b3.size) * 4
    cost = pl.CostEstimate(
        flops=2 * B * (IN_DIM * H1_DIM + H1_DIM * H2_DIM + H2_DIM * OUT_PAD),
        transcendentals=B * OUT_PAD,
        bytes_accessed=B * IN_DIM * 4 + B * OUT_PAD * 4 + weight_bytes,
    )

    out_pad = pl.pallas_call(
        mlp_kernel,
        out_shape=jax.ShapeDtypeStruct((B, OUT_PAD), jnp.float32),
        grid=grid,
        in_specs=[
            pl.BlockSpec((tb, IN_DIM), lambda i: (i, 0)),       # x: tiled over batch
            pl.BlockSpec((IN_DIM, H1_DIM), lambda i: (0, 0)),   # w1: resident
            pl.BlockSpec((1, H1_DIM), lambda i: (0, 0)),        # b1: resident
            pl.BlockSpec((H1_DIM, H2_DIM), lambda i: (0, 0)),   # w2: resident
            pl.BlockSpec((1, H2_DIM), lambda i: (0, 0)),        # b2: resident
            pl.BlockSpec((H2_DIM, OUT_PAD), lambda i: (0, 0)),  # w3 (padded): resident
            pl.BlockSpec((1, OUT_PAD), lambda i: (0, 0)),       # b3 (padded): resident
        ],
        out_specs=pl.BlockSpec((tb, OUT_PAD), lambda i: (i, 0)),
        compiler_params=pltpu.CompilerParams(
            dimension_semantics=("parallel",),
        ),
        cost_estimate=cost,
    )(x_flat, w1, b1, w2, b2, w3, b3)

    return out_pad[:, :OUT_DIM]


def reference_forward(x_nchw, params_f32):
    """Pure-JAX reference matching the kernel's numerics (bf16 MXU inputs,
    fp32 accumulation / bias / ReLU / exact softmax)."""
    w1, b1, w2, b2, w3, b3 = params_f32

    def bdot(a, w):
        return jnp.dot(a.astype(jnp.bfloat16), w.astype(jnp.bfloat16),
                       preferred_element_type=jnp.float32)

    x = x_nchw.reshape(x_nchw.shape[0], -1)
    h1 = jnp.maximum(bdot(x, w1) + b1, 0.0)
    h2 = jnp.maximum(bdot(h1, w2) + b2, 0.0)
    logits = bdot(h2, w3) + b3
    return jax.nn.softmax(logits, axis=1)


def _check(x, params_f32, prepared):
    out = jax.block_until_ready(net_forward(x, prepared))
    ref = reference_forward(x, params_f32)
    B = x.shape[0]
    assert out.shape == (B, OUT_DIM), out.shape
    assert bool(jnp.all(jnp.isfinite(out))), "non-finite output"
    # Tolerances account for bf16 MXU inputs (fp32 accumulation).
    assert jnp.allclose(out, ref, atol=3e-3, rtol=3e-2), f"mismatch vs reference (B={B})"
    assert jnp.allclose(jnp.sum(out, axis=1), 1.0, atol=1e-3), f"softmax rows != 1 (B={B})"
    return out


if __name__ == "__main__":
    key = jax.random.PRNGKey(0)
    k_params, k_x1, k_x2, k_x3 = jax.random.split(key, 4)

    params_f32 = init_params(k_params)
    prepared = prepare_params(params_f32)

    # Tiny batch (single block, B not a multiple of 16): (8, 1, 28, 28) NCHW.
    x_small = jax.random.normal(k_x1, (8, 1, 28, 28), dtype=jnp.float32)
    _check(x_small, params_f32, prepared)

    # Medium batch: split into 2 parallel tiles (tile=160), ragged last block.
    x_mid = jax.random.normal(k_x2, (300, 1, 28, 28), dtype=jnp.float32)
    _check(x_mid, params_f32, prepared)

    # Large batch: tile_b=512, grid=2 with a ragged tail block (no pad copy).
    x_big = jax.random.normal(k_x3, (700, 1, 28, 28), dtype=jnp.float32)
    _check(x_big, params_f32, prepared)

    print("KERNEL_OK")
</pallas_src>

<mosaic_0001>
module attributes {stable_mosaic.version = 11 : i64} {
  func.func @mlp_kernel(%arg0: i32, %arg1: memref<8x784xf32, #tpu.memory_space<vmem>>, %arg2: memref<784x128xbf16, #tpu.memory_space<vmem>>, %arg3: memref<1x128xf32, #tpu.memory_space<vmem>>, %arg4: memref<128x256xbf16, #tpu.memory_space<vmem>>, %arg5: memref<1x256xf32, #tpu.memory_space<vmem>>, %arg6: memref<256x128xbf16, #tpu.memory_space<vmem>>, %arg7: memref<1x128xf32, #tpu.memory_space<vmem>>, %arg8: memref<8x128xf32, #tpu.memory_space<vmem>>) attributes {dimension_semantics = [#tpu.dimension_semantics<parallel>], iteration_bounds = array<i64: 1>, scalar_prefetch = 0 : i64, scratch_operands = 0 : i64, tpu.core_type = #tpu.core_type<tc>, window_params = [{transform_indices = @transform_0, window_bounds = array<i64: 8, 784>}, {pipeline_mode = #tpu.pipeline_mode<synchronous>, transform_indices = @transform_1, window_bounds = array<i64: 784, 128>}, {pipeline_mode = #tpu.pipeline_mode<synchronous>, transform_indices = @transform_2, window_bounds = array<i64: 1, 128>}, {pipeline_mode = #tpu.pipeline_mode<synchronous>, transform_indices = @transform_3, window_bounds = array<i64: 128, 256>}, {pipeline_mode = #tpu.pipeline_mode<synchronous>, transform_indices = @transform_4, window_bounds = array<i64: 1, 256>}, {pipeline_mode = #tpu.pipeline_mode<synchronous>, transform_indices = @transform_5, window_bounds = array<i64: 256, 128>}, {pipeline_mode = #tpu.pipeline_mode<synchronous>, transform_indices = @transform_6, window_bounds = array<i64: 1, 128>}, {transform_indices = @transform_7, window_bounds = array<i64: 8, 128>}]} {
    %c0 = arith.constant 0 : index
    %c0_0 = arith.constant 0 : index
    %0 = vector.load %arg1[%c0, %c0_0] : memref<8x784xf32, #tpu.memory_space<vmem>>, vector<8x784xf32>
    %1 = arith.truncf %0 : vector<8x784xf32> to vector<8x784xbf16>
    %c0_1 = arith.constant 0 : index
    %c0_2 = arith.constant 0 : index
    %2 = vector.load %arg2[%c0_1, %c0_2] : memref<784x128xbf16, #tpu.memory_space<vmem>>, vector<784x128xbf16>
    %cst = arith.constant dense<0.000000e+00> : vector<8x128xf32>
    %3 = tpu.matmul %1, %2, %cst {dimension_numbers = #tpu.dot_dimension_numbers<[1], [0], [0], [1], [0, 0, 1, 1], [], []>} : vector<8x784xbf16>, vector<784x128xbf16>, vector<8x128xf32> -> vector<8x128xf32>
    %c0_3 = arith.constant 0 : index
    %c0_4 = arith.constant 0 : index
    %4 = vector.load %arg3[%c0_3, %c0_4] : memref<1x128xf32, #tpu.memory_space<vmem>>, vector<1x128xf32>
    %5 = vector.broadcast %4 : vector<1x128xf32> to vector<8x128xf32>
    %6 = arith.addf %3, %5 : vector<8x128xf32>
    %cst_5 = arith.constant 0.000000e+00 : f32
    %7 = vector.broadcast %cst_5 : f32 to vector<8x128xf32>
    %8 = arith.maximumf %6, %7 : vector<8x128xf32>
    %9 = arith.truncf %8 : vector<8x128xf32> to vector<8x128xbf16>
    %c0_6 = arith.constant 0 : index
    %c0_7 = arith.constant 0 : index
    %10 = vector.load %arg4[%c0_6, %c0_7] : memref<128x256xbf16, #tpu.memory_space<vmem>>, vector<128x256xbf16>
    %cst_8 = arith.constant dense<0.000000e+00> : vector<8x256xf32>
    %11 = tpu.matmul %9, %10, %cst_8 {dimension_numbers = #tpu.dot_dimension_numbers<[1], [0], [0], [1], [0, 0, 1, 1], [], []>} : vector<8x128xbf16>, vector<128x256xbf16>, vector<8x256xf32> -> vector<8x256xf32>
    %c0_9 = arith.constant 0 : index
    %c0_10 = arith.constant 0 : index
    %12 = vector.load %arg5[%c0_9, %c0_10] : memref<1x256xf32, #tpu.memory_space<vmem>>, vector<1x256xf32>
    %13 = vector.broadcast %12 : vector<1x256xf32> to vector<8x256xf32>
    %14 = arith.addf %11, %13 : vector<8x256xf32>
    %cst_11 = arith.constant 0.000000e+00 : f32
    %15 = vector.broadcast %cst_11 : f32 to vector<8x256xf32>
    %16 = arith.maximumf %14, %15 : vector<8x256xf32>
    %17 = arith.truncf %16 : vector<8x256xf32> to vector<8x256xbf16>
    %c0_12 = arith.constant 0 : index
    %c0_13 = arith.constant 0 : index
    %18 = vector.load %arg6[%c0_12, %c0_13] : memref<256x128xbf16, #tpu.memory_space<vmem>>, vector<256x128xbf16>
    %cst_14 = arith.constant dense<0.000000e+00> : vector<8x128xf32>
    %19 = tpu.matmul %17, %18, %cst_14 {dimension_numbers = #tpu.dot_dimension_numbers<[1], [0], [0], [1], [0, 0, 1, 1], [], []>} : vector<8x256xbf16>, vector<256x128xbf16>, vector<8x128xf32> -> vector<8x128xf32>
    %c0_15 = arith.constant 0 : index
    %c0_16 = arith.constant 0 : index
    %20 = vector.load %arg7[%c0_15, %c0_16] : memref<1x128xf32, #tpu.memory_space<vmem>>, vector<1x128xf32>
    %21 = vector.broadcast %20 : vector<1x128xf32> to vector<8x128xf32>
    %22 = arith.addf %19, %21 : vector<8x128xf32>
    %cst_17 = arith.constant dense<0xFF800000> : vector<8xf32>
    %23 = vector.multi_reduction <maximumf>, %22, %cst_17 [1] : vector<8x128xf32> to vector<8xf32>
    %24 = vector.shape_cast %23 : vector<8xf32> to vector<8x1xf32>
    %25 = vector.broadcast %24 : vector<8x1xf32> to vector<8x128xf32>
    %26 = arith.subf %22, %25 : vector<8x128xf32>
    %27 = math.exp %26 : vector<8x128xf32>
    %cst_18 = arith.constant dense<0.000000e+00> : vector<8xf32>
    %28 = vector.multi_reduction <add>, %27, %cst_18 [1] : vector<8x128xf32> to vector<8xf32>
    %29 = vector.shape_cast %28 : vector<8xf32> to vector<8x1xf32>
    %30 = vector.broadcast %29 : vector<8x1xf32> to vector<8x128xf32>
    %31 = arith.divf %27, %30 : vector<8x128xf32>
    %c0_19 = arith.constant 0 : index
    %c0_20 = arith.constant 0 : index
    %32 = vector.load %arg8[%c0_19, %c0_20] : memref<8x128xf32, #tpu.memory_space<vmem>>, vector<8x128xf32>
    tpu.vector_store %arg8[%c0_19, %c0_20], %31 {strides = array<i32>} : memref<8x128xf32, #tpu.memory_space<vmem>>, vector<8x128xf32>,
    return
  }
  func.func @transform_0(%arg0: i32) -> (i32, i32) {
    %c0_i32 = arith.constant 0 : i32
    %c0_i32_0 = arith.constant 0 : i32
    return %arg0, %c0_i32 : i32, i32
  }
  func.func @transform_1(%arg0: i32) -> (i32, i32) {
    %c0_i32 = arith.constant 0 : i32
    %c0_i32_0 = arith.constant 0 : i32
    %c0_i32_1 = arith.constant 0 : i32
    return %c0_i32, %c0_i32_0 : i32, i32
  }
  func.func @transform_2(%arg0: i32) -> (i32, i32) {
    %c0_i32 = arith.constant 0 : i32
    %c0_i32_0 = arith.constant 0 : i32
    %c0_i32_1 = arith.constant 0 : i32
    return %c0_i32, %c0_i32_0 : i32, i32
  }
  func.func @transform_3(%arg0: i32) -> (i32, i32) {
    %c0_i32 = arith.constant 0 : i32
    %c0_i32_0 = arith.constant 0 : i32
    %c0_i32_1 = arith.constant 0 : i32
    return %c0_i32, %c0_i32_0 : i32, i32
  }
  func.func @transform_4(%arg0: i32) -> (i32, i32) {
    %c0_i32 = arith.constant 0 : i32
    %c0_i32_0 = arith.constant 0 : i32
    %c0_i32_1 = arith.constant 0 : i32
    return %c0_i32, %c0_i32_0 : i32, i32
  }
  func.func @transform_5(%arg0: i32) -> (i32, i32) {
    %c0_i32 = arith.constant 0 : i32
    %c0_i32_0 = arith.constant 0 : i32
    %c0_i32_1 = arith.constant 0 : i32
    return %c0_i32, %c0_i32_0 : i32, i32
  }
  func.func @transform_6(%arg0: i32) -> (i32, i32) {
    %c0_i32 = arith.constant 0 : i32
    %c0_i32_0 = arith.constant 0 : i32
    %c0_i32_1 = arith.constant 0 : i32
    return %c0_i32, %c0_i32_0 : i32, i32
  }
  func.func @transform_7(%arg0: i32) -> (i32, i32) {
    %c0_i32 = arith.constant 0 : i32
    %c0_i32_0 = arith.constant 0 : i32
    return %arg0, %c0_i32 : i32, i32
  }
}

</mosaic_0001>

<bundles_post_ra>
// kernel: net_forward.1
= control target key start
LH: loop header
LB: loop body
LE: loop exit
PB: predicated region body
PF: predicated region fallthrough
CT: control target
= control target key end

     0   :  { %s1668_s0 = inlined_call_operand.vmem [shape: f32[8,784], index: 0, kind: input, shape index: {}]   ;;  %s1669_s1 = inlined_call_operand.vmem [shape: bf16[784,128], index: 1, kind: input, shape index: {}]   ;;  %s1670_s2 = inlined_call_operand.vmem [shape: f32[1,128], index: 2, kind: input, shape index: {}]   ;;  %s1671_s3 = inlined_call_operand.vmem [shape: bf16[128,256], index: 3, kind: input, shape index: {}]   ;;  %s1672_s4 = inlined_call_operand.vmem [shape: f32[1,256], index: 4, kind: input, shape index: {}]   ;;  %s1673_s5 = inlined_call_operand.vmem [shape: bf16[256,128], index: 5, kind: input, shape index: {}]   ;;  %s1674_s6 = inlined_call_operand.vmem [shape: f32[1,128], index: 6, kind: input, shape index: {}]   ;;  %s1675_s7 = inlined_call_operand.hbm [shape: f32[8,128], index: 7, kind: output, shape index: {}]  }
   0x1   :  { %v1196_v0 = vld [vmem:[%s1669_s1 + $0x38] sm:$0xff]  ;;  %v1195_v3 = vld [vmem:[%s1669_s1 + $0x30] sm:$0xff]  ;;  %v1194_v8 = vld [vmem:[%s1669_s1 + $0x28] sm:$0xff] }
   0x2   :  { %v1204_v1 = vld [vmem:[%s1669_s1 + $0x78] sm:$0xff]  ;;  %442 = vmatpush.bf16.msra.mxu0 %v1196_v0  ;;  %v1203_v4 = vld [vmem:[%s1669_s1 + $0x70] sm:$0xff]  ;;  %v1202_v9 = vld [vmem:[%s1669_s1 + $0x68] sm:$0xff] }
   0x3   :  { %v1212_v2 = vld [vmem:[%s1669_s1 + $0xb8] sm:$0xff]  ;;  %455 = vmatpush.bf16.msra.mxu1 %v1204_v1  ;;  %v1211_v5 = vld [vmem:[%s1669_s1 + $0xb0] sm:$0xff]  ;;  %v1210_v10 = vld [vmem:[%s1669_s1 + $0xa8] sm:$0xff] }
   0x4   :  { %468 = vmatpush.bf16.msra.mxu2 %v1212_v2  ;;  %v1220_v6 = vld [vmem:[%s1669_s1 + $0xf8] sm:$0xff]  ;;  %v1219_v7 = vld [vmem:[%s1669_s1 + $0xf0] sm:$0xff]  ;;  %v1218_v11 = vld [vmem:[%s1669_s1 + $0xe8] sm:$0xff] }
   0x5   :  { %481 = vmatpush.bf16.msra.mxu3 %v1220_v6  ;;  %v1193_v12 = vld [vmem:[%s1669_s1 + $0x20] sm:$0xff]  ;;  %v1192_v16 = vld [vmem:[%s1669_s1 + $0x18] sm:$0xff] }
   0x6   :  { %443 = vmatpush.bf16.msra.mxu0 %v1195_v3  ;;  %v1201_v13 = vld [vmem:[%s1669_s1 + $0x60] sm:$0xff]  ;;  %v1200_v17 = vld [vmem:[%s1669_s1 + $0x58] sm:$0xff] }
   0x7   :  { %456 = vmatpush.bf16.msra.mxu1 %v1203_v4  ;;  %v1209_v14 = vld [vmem:[%s1669_s1 + $0xa0] sm:$0xff]  ;;  %v1208_v18 = vld [vmem:[%s1669_s1 + $0x98] sm:$0xff] }
   0x8   :  { %469 = vmatpush.bf16.msra.mxu2 %v1211_v5  ;;  %v1217_v15 = vld [vmem:[%s1669_s1 + $0xe0] sm:$0xff] }
   0x9   :  { %482 = vmatpush.bf16.msra.mxu3 %v1219_v7 }
   0xa   :  { %444 = vmatpush.bf16.msra.mxu0 %v1194_v8 }
   0xb   :  { %457 = vmatpush.bf16.msra.mxu1 %v1202_v9 }
   0xc   :  { %470 = vmatpush.bf16.msra.mxu2 %v1210_v10 }
   0xd   :  { %483 = vmatpush.bf16.msra.mxu3 %v1218_v11 }
   0xe   :  { %445 = vmatpush.bf16.msra.mxu0 %v1193_v12 }
   0xf   :  { %458 = vmatpush.bf16.msra.mxu1 %v1201_v13 }
  0x10   :  { %471 = vmatpush.bf16.msra.mxu2 %v1209_v14 }
  0x11   :  { %12 = vsyncpa [#allocation3], 0  ;;  %484 = vmatpush.bf16.msra.mxu3 %v1217_v15  ;;  %v1216_v19 = vld [vmem:[%s1669_s1 + $0xd8] sm:$0xff]  ;;  %v1191_v20 = vld [vmem:[%s1669_s1 + $0x10] sm:$0xff]  ;;  %vm438_vm0 = vcmask 130048   ;;  %s855_s21 = sshll.u32 %s1675_s7, 4  ;;  %s856_s21 = int_to_ptr.hbm [resolvable:$true] %s855_s21 }
  0x12   :  { %446 = vmatpush.bf16.msra.mxu0 %v1192_v16  ;;  %v1199_v21 = vld [vmem:[%s1669_s1 + $0x50] sm:$0xff]  ;;  %v1190_v24 = vld [vmem:[%s1669_s1 + $0x8] sm:$0xff]  ;;  %v1189_v27 = vld [vmem:[%s1669_s1] sm:$0xff] }
  0x13   :  { %459 = vmatpush.bf16.msra.mxu1 %v1200_v17  ;;  %v1207_v22 = vld [vmem:[%s1669_s1 + $0x90] sm:$0xff]  ;;  %v1198_v25 = vld [vmem:[%s1669_s1 + $0x48] sm:$0xff]  ;;  %v1197_v29 = vld [vmem:[%s1669_s1 + $0x40] sm:$0xff] }
  0x14   :  { %472 = vmatpush.bf16.msra.mxu2 %v1208_v18  ;;  %v1215_v23 = vld [vmem:[%s1669_s1 + $0xd0] sm:$0xff]  ;;  %v1206_v26 = vld [vmem:[%s1669_s1 + $0x88] sm:$0xff]  ;;  %v28_v30 = vld [vmem:[%s1668_s0] sm:$0xff] }
  0x15   :  { %485 = vmatpush.bf16.msra.mxu3 %v1216_v19  ;;  %v1214_v28 = vld [vmem:[%s1669_s1 + $0xc8] sm:$0xff]  ;;  %v1228_v32 = vld [vmem:[%s1669_s1 + $0x138] sm:$0xff]  ;;  %v1205_v34 = vld [vmem:[%s1669_s1 + $0x80] sm:$0xff]  ;;  %v35_v36 = vpack.c.bf16 %v28_v30, %v28_v30 }
  0x16   :  { %447 = vmatpush.bf16.msra.mxu0 %v1191_v20  ;;  %v29_v31 = vld [vmem:[%s1668_s0 + $0x8] sm:$0xff]  ;;  %v1236_v33 = vld [vmem:[%s1669_s1 + $0x178] sm:$0xff]  ;;  %v30_v35 = vld [vmem:[%s1668_s0 + $0x10] sm:$0xff] }
  0x17   :  { %460 = vmatpush.bf16.msra.mxu1 %v1199_v21  ;;  %v36_v37 = vpack.c.bf16 %v29_v31, %v29_v31  ;;  %v1213_v38 = vld [vmem:[%s1669_s1 + $0xc0] sm:$0xff]  ;;  %v31_v40 = vld [vmem:[%s1668_s0 + $0x18] sm:$0xff]  ;;  %v1227_v41 = vld [vmem:[%s1669_s1 + $0x130] sm:$0xff]  ;;  %v37_v43 = vpack.c.bf16 %v30_v35, %v30_v35 }
  0x18   :  { %473 = vmatpush.bf16.msra.mxu2 %v1207_v22  ;;  %v1237_v39 = vld [vmem:[%s1669_s1 + $0x180] sm:$0xff]  ;;  %v1235_v42 = vld [vmem:[%s1669_s1 + $0x170] sm:$0xff]  ;;  %v38_v44 = vpack.c.bf16 %v31_v40, %v31_v40  ;;  %v1226_v45 = vld [vmem:[%s1669_s1 + $0x128] sm:$0xff] }
  0x19   :  { %486 = vmatpush.bf16.msra.mxu3 %v1215_v23  ;;  %v1234_v46 = vld [vmem:[%s1669_s1 + $0x168] sm:$0xff]  ;;  %v1225_v47 = vld [vmem:[%s1669_s1 + $0x120] sm:$0xff]  ;;  %v1224_v49 = vld [vmem:[%s1669_s1 + $0x118] sm:$0xff] }
  0x1a   :  { %448 = vmatpush.bf16.msra.mxu0 %v1190_v24  ;;  %v1233_v48 = vld [vmem:[%s1669_s1 + $0x160] sm:$0xff]  ;;  %v1232_v50 = vld [vmem:[%s1669_s1 + $0x158] sm:$0xff]  ;;  %v34_v51 = vld [vmem:[%s1668_s0 + $0x30] sm:$0xff] }
  0x1b   :  { %461 = vmatpush.bf16.msra.mxu1 %v1198_v25  ;;  %v1223_v52 = vld [vmem:[%s1669_s1 + $0x110] sm:$0xff]  ;;  %v41_v54 = vpack.c.bf16 %v34_v51, %v34_v51  ;;  %v1222_v55 = vld [vmem:[%s1669_s1 + $0x108] sm:$0xff]  ;;  %v1221_v57 = vld [vmem:[%s1669_s1 + $0x100] sm:$0xff] }
  0x1c   :  { %474 = vmatpush.bf16.msra.mxu2 %v1206_v26  ;;  %v1231_v53 = vld [vmem:[%s1669_s1 + $0x150] sm:$0xff]  ;;  %v1230_v56 = vld [vmem:[%s1669_s1 + $0x148] sm:$0xff]  ;;  %v1229_v58 = vld [vmem:[%s1669_s1 + $0x140] sm:$0xff] }
  0x1d   :  { %487 = vmatpush.bf16.msra.mxu3 %v1214_v28  ;;  %v32_v59 = vld [vmem:[%s1668_s0 + $0x20] sm:$0xff]  ;;  %v33_v60 = vld [vmem:[%s1668_s0 + $0x28] sm:$0xff]  ;;  %v1119_v63 = vld [vmem:[%s1671_s3 + $0x70] sm:$0xf] }
  0x1e   :  { %449 = vmatpush.bf16.msra.mxu0 %v1189_v27  ;;  %v39_v61 = vpack.c.bf16 %v32_v59, %v32_v59  ;;  %v40_v62 = vpack.c.bf16 %v33_v60, %v33_v60  ;;  %v1253_v0 = vld [vmem:[%s1671_s3 + $0x74] sm:$0xf0]  ;;  %v1252_v1 = vld [vmem:[%s1671_s3 + $0x74] sm:$0xf]  ;;  %v1121_v3 = vld [vmem:[%s1671_s3 + $0x78] sm:$0xf0] }
  0x1f   :  { %462 = vmatpush.bf16.msra.mxu1 %v1197_v29  ;;  %v1120_v2 = vor.u32 %v1253_v0, %v1119_v63  ;;  %v1124_v4 = vor.u32 %v1252_v1, %v1121_v3  ;;  %v1111_v5 = vld [vmem:[%s1671_s3 + $0x60] sm:$0xf]  ;;  %v1251_v6 = vld [vmem:[%s1671_s3 + $0x64] sm:$0xf0]  ;;  %v1250_v7 = vld [vmem:[%s1671_s3 + $0x64] sm:$0xf] }
  0x20   :  { %475 = vmatpush.bf16.msra.mxu2 %v1205_v34  ;;  %v1112_v8 = vor.u32 %v1251_v6, %v1111_v5  ;;  %v1113_v9 = vld [vmem:[%s1671_s3 + $0x68] sm:$0xf0]  ;;  %v1103_v11 = vld [vmem:[%s1671_s3 + $0x50] sm:$0xf]  ;;  %v1249_v12 = vld [vmem:[%s1671_s3 + $0x54] sm:$0xf0] }
  0x21   :  { %450 = vmatmul.bf16.vlgmr.msra.gmra.mxu0 %v35_v36  ;;  %488 = vmatpush.bf16.msra.mxu3 %v1213_v38  ;;  %v1116_v10 = vor.u32 %v1250_v7, %v1113_v9  ;;  %v1248_v13 = vld [vmem:[%s1671_s3 + $0x54] sm:$0xf]  ;;  %v1104_v14 = vor.u32 %v1249_v12, %v1103_v11  ;;  %v1105_v15 = vld [vmem:[%s1671_s3 + $0x58] sm:$0xf0]  ;;  %v1095_v17 = vld [vmem:[%s1671_s3 + $0x40] sm:$0xf] }
  0x22   :  { %494 = vmatpush.bf16.msrb.mxu0 %v1228_v32  ;;  %463 = vmatmul.bf16.vlgmr.msra.gmra.mxu1 %v36_v37  ;;  %v1108_v16 = vor.u32 %v1248_v13, %v1105_v15  ;;  %v1247_v18 = vld [vmem:[%s1671_s3 + $0x44] sm:$0xf0]  ;;  %v1246_v19 = vld [vmem:[%s1671_s3 + $0x44] sm:$0xf]  ;;  %v1097_v21 = vld [vmem:[%s1671_s3 + $0x48] sm:$0xf0] }
  0x23   :  { %507 = vmatpush.bf16.msrb.mxu1 %v1236_v33  ;;  %476 = vmatmul.bf16.vlgmr.msra.gmra.mxu2 %v37_v43  ;;  %v1096_v20 = vor.u32 %v1247_v18, %v1095_v17  ;;  %v1100_v22 = vor.u32 %v1246_v19, %v1097_v21  ;;  %v1087_v23 = vld [vmem:[%s1671_s3 + $0x30] sm:$0xf]  ;;  %v1245_v24 = vld [vmem:[%s1671_s3 + $0x34] sm:$0xf0]  ;;  %v1244_v25 = vld [vmem:[%s1671_s3 + $0x34] sm:$0xf] }
  0x24   :  { %527 = vmatpush.bf16.msrb.mxu2 %v1237_v39  ;;  %489 = vmatmul.bf16.vlgmr.msra.gmra.mxu3 %v38_v44  ;;  %v1088_v26 = vor.u32 %v1245_v24, %v1087_v23  ;;  %v1089_v27 = vld [vmem:[%s1671_s3 + $0x38] sm:$0xf0]  ;;  %v1079_v29 = vld [vmem:[%s1671_s3 + $0x20] sm:$0xf]  ;;  %v1243_v30 = vld [vmem:[%s1671_s3 + $0x24] sm:$0xf0] }
  0x25   :  { %637 = vmatpush.bf16.msrb.mxu3 %v1120_v2  ;;  %v1092_v28 = vor.u32 %v1244_v25, %v1089_v27  ;;  %v1242_v31 = vld [vmem:[%s1671_s3 + $0x24] sm:$0xf]  ;;  %v1080_v32 = vor.u32 %v1243_v30, %v1079_v29  ;;  %v1081_v33 = vld [vmem:[%s1671_s3 + $0x28] sm:$0xf0]  ;;  %v1071_v35 = vld [vmem:[%s1671_s3 + $0x10] sm:$0xf] }
  0x26   :  { %495 = vmatpush.bf16.msrb.mxu0 %v1227_v41  ;;  %v1084_v34 = vor.u32 %v1242_v31, %v1081_v33  ;;  %v1241_v36 = vld [vmem:[%s1671_s3 + $0x14] sm:$0xf0]  ;;  %v1240_v37 = vld [vmem:[%s1671_s3 + $0x14] sm:$0xf]  ;;  %v1073_v39 = vld [vmem:[%s1671_s3 + $0x18] sm:$0xf0] }
  0x27   :  { %508 = vmatpush.bf16.msrb.mxu1 %v1235_v42  ;;  %v1072_v38 = vor.u32 %v1241_v36, %v1071_v35  ;;  %v1076_v42 = vor.u32 %v1240_v37, %v1073_v39  ;;  %v1063_v43 = vld [vmem:[%s1671_s3] sm:$0xf]  ;;  %v1239_v44 = vld [vmem:[%s1671_s3 + $0x4] sm:$0xf0]  ;;  %v1261_v51 = vld [vmem:[%s1673_s5 + $0x38] sm:$0xff] }
  0x28   :  { %650 = vmatpush.bf16.msra.mxu2 %v1124_v4  ;;  %v1267_v59 = vld [vmem:[%s1673_s5 + $0x68] sm:$0xff]  ;;  %v1258_v63 = vld [vmem:[%s1673_s5 + $0x20] sm:$0xff]  ;;  %v1257_v2 = vld [vmem:[%s1673_s5 + $0x18] sm:$0xff] }
  0x29   :  { %638 = vmatpush.bf16.msrb.mxu3 %v1112_v8  ;;  %v1266_v0 = vld [vmem:[%s1673_s5 + $0x60] sm:$0xff]  ;;  %v1265_v3 = vld [vmem:[%s1673_s5 + $0x58] sm:$0xff]  ;;  %v1256_v6 = vld [vmem:[%s1673_s5 + $0x10] sm:$0xff] }
  0x2a   :  { %496 = vmatpush.bf16.msrb.mxu0 %v1226_v45  ;;  %v1238_v45 = vld [vmem:[%s1671_s3 + $0x4] sm:$0xf]  ;;  %v1264_v7 = vld [vmem:[%s1673_s5 + $0x50] sm:$0xff]  ;;  %v1255_v19 = vld [vmem:[%s1673_s5 + $0x8] sm:$0xff] }
  0x2b   :  { %509 = vmatpush.bf16.msrb.mxu1 %v1234_v46  ;;  %v1064_v46 = vor.u32 %v1239_v44, %v1063_v43  ;;  %v1254_v21 = vld [vmem:[%s1673_s5] sm:$0xff] }
  0x2c   :  { %651 = vmatpush.bf16.msra.mxu2 %v1116_v10  ;;  %v551_v23 = vld [vmem:[%s1672_s4] sm:$0x3]  ;;  %s1303_s4 = smov [#allocation2]  }
  0x2d   :  { %639 = vmatpush.bf16.msrb.mxu3 %v1104_v14  ;;  %v553_v24 = vperm.slane %v551_v23, 0  ;;  %v554_v25 = vperm.slane %v551_v23, 1  ;;  %v1272_v36 = vld [vmem:[%s1674_s6] ss:$0 sm:$0xff]  ;;  %s853_s6 = sshll.u32 %s1303_s4, 4  ;;  %s854_s6 = int_to_ptr.vmem [resolvable:$true] %s853_s6 }
  0x2e   :  { %497 = vmatpush.bf16.msrb.mxu0 %v1225_v47  ;;  %v1065_v47 = vld [vmem:[%s1671_s3 + $0x8] sm:$0xf0] }
  0x2f   :  { %510 = vmatpush.bf16.msrb.mxu1 %v1233_v48  ;;  %v1068_v48 = vor.u32 %v1238_v45, %v1065_v47 }
  0x30   :  { %652 = vmatpush.bf16.msra.mxu2 %v1108_v16 }
  0x31   :  { %640 = vmatpush.bf16.msrb.mxu3 %v1096_v20  ;;  %v1263_v20 = vld [vmem:[%s1673_s5 + $0x48] sm:$0xff] }
  0x32   :  { %498 = vmatpush.bf16.msrb.mxu0 %v1224_v49 }
  0x33   :  { %511 = vmatpush.bf16.msrb.mxu1 %v1232_v50  ;;  %1060 = vmatmul.msk.bf16.vlgmr.msrb.gmra.mxu2 %vm438_vm0, %v41_v54 }
  0x34   :  { %653 = vmatpush.bf16.msra.mxu2 %v1100_v22  ;;  %v1262_v22 = vld [vmem:[%s1673_s5 + $0x40] sm:$0xff] }
  0x35   :  { %641 = vmatpush.bf16.msrb.mxu3 %v1088_v26 }
  0x36   :  { %499 = vmatpush.bf16.msrb.mxu0 %v1223_v52  ;;  %v1269_v52 = vld [vmem:[%s1673_s5 + $0x78] sm:$0xff] }
  0x37   :  { %512 = vmatpush.bf16.msrb.mxu1 %v1231_v53 }
  0x38   :  { %654 = vmatpush.bf16.msra.mxu2 %v1092_v28 }
  0x39   :  { %642 = vmatpush.bf16.msrb.mxu3 %v1080_v32 }
  0x3a   :  { %500 = vmatpush.bf16.msrb.mxu0 %v1222_v55  ;;  %v1260_v55 = vld [vmem:[%s1673_s5 + $0x30] sm:$0xff] }
  0x3b   :  { %513 = vmatpush.bf16.msrb.mxu1 %v1230_v56  ;;  %v1268_v56 = vld [vmem:[%s1673_s5 + $0x70] sm:$0xff] }
  0x3c   :  { %655 = vmatpush.bf16.msra.mxu2 %v1084_v34 }
  0x3d   :  { %643 = vmatpush.bf16.msrb.mxu3 %v1072_v38 }
  0x3e   :  { %501 = vmatpush.bf16.msrb.mxu0 %v1221_v57  ;;  %v1271_v57 = vld [vmem:[%s1670_s2] ss:$0 sm:$0xff] }
  0x3f   :  { %514 = vmatpush.bf16.msrb.mxu1 %v1229_v58  ;;  %v1259_v58 = vld [vmem:[%s1673_s5 + $0x28] sm:$0xff] }
  0x40   :  { %656 = vmatpush.bf16.msra.mxu2 %v1076_v42 }
  0x41   :  { %502 = vmatmul.bf16.vlgmr.msrb.gmra.mxu0 %v39_v61  ;;  %644 = vmatpush.bf16.msrb.mxu3 %v1064_v46 }
  0x42   :  { %515 = vmatmul.bf16.vlgmr.msrb.gmra.mxu1 %v40_v62  ;;  %799 = vmatpush.bf16.msra.mxu0 %v1261_v51 }
  0x43   :  { %812 = vmatpush.bf16.msra.mxu1 %v1269_v52 }
  0x44   :  { %657 = vmatpush.bf16.msra.mxu2 %v1068_v48 }
  0x46   :  { %800 = vmatpush.bf16.msra.mxu0 %v1260_v55 }
  0x47   :  { %813 = vmatpush.bf16.msra.mxu1 %v1268_v56 }
  0x4a   :  { %801 = vmatpush.bf16.msra.mxu0 %v1259_v58 }
  0x4b   :  { %814 = vmatpush.bf16.msra.mxu1 %v1267_v59 }
  0x4e   :  { %802 = vmatpush.bf16.msra.mxu0 %v1258_v63 }
  0x4f   :  { %815 = vmatpush.bf16.msra.mxu1 %v1266_v0 }
  0x52   :  { %803 = vmatpush.bf16.msra.mxu0 %v1257_v2 }
  0x53   :  { %816 = vmatpush.bf16.msra.mxu1 %v1265_v3 }
  0x56   :  { %804 = vmatpush.bf16.msra.mxu0 %v1256_v6 }
  0x57   :  { %817 = vmatpush.bf16.msra.mxu1 %v1264_v7 }
  0x5a   :  { %805 = vmatpush.bf16.msra.mxu0 %v1255_v19 }
  0x5b   :  { %818 = vmatpush.bf16.msra.mxu1 %v1263_v20 }
  0x5e   :  { %806 = vmatpush.bf16.msra.mxu0 %v1254_v21 }
  0x5f   :  { %819 = vmatpush.bf16.msra.mxu1 %v1262_v22 }
  0x9e   :  { %v451_v40 = vpop.f32.mrf.mxu0 }
  0x9f   :  { %v464_v41 = vpop.f32.mrf.mxu1  ;;  %v452_v60 = vadd.f32 %v1271_v57, %v451_v40 }
  0xa1   :  { %v465_v1 = vadd.f32 %v464_v41, %v452_v60 }
  0xa6   :  { %v453_v49 = vpop.f32.mrf.mxu0  ;;  %v477_v53 = vpop.f32.mrf.mxu2 }
  0xa7   :  { %v466_v50 = vpop.f32.mrf.mxu1  ;;  %v490_v54 = vpop.f32.mrf.mxu3  ;;  %v478_v4 = vadd.f32 %v477_v53, %v465_v1 }
  0xa9   :  { %v491_v8 = vadd.f32 %v490_v54, %v478_v4 }
  0xae   :  { %v479_v61 = vpop.f32.mrf.mxu2 }
  0xaf   :  { %v492_v62 = vpop.f32.mrf.mxu3 }
  0xb6   :  { %v529_v5 = vpop.f32.mrf.mxu2 }
  0xbe   :  { %v503_v9 = vpop.f32.mrf.mxu0  ;;  %v531_v13 = vpop.f32.mrf.mxu2 }
  0xbf   :  { %v516_v10 = vpop.f32.mrf.mxu1  ;;  %v504_v11 = vadd.f32 %v503_v9, %v491_v8 }
  0xc1   :  { %v517_v12 = vadd.f32 %v516_v10, %v504_v11 }
  0xc3   :  { %v530_v14 = vadd.f32 %v529_v5, %v517_v12 }
  0xc5   :  { %v533_v15 = vmax.f32 %v530_v14, 0.0 }
  0xc6   :  { %v505_v16 = vpop.f32.mrf.mxu0 }
  0xc7   :  { %v518_v17 = vpop.f32.mrf.mxu1  ;;  %v534_v18 = vpack.c.bf16 %v533_v15, %v533_v15 }
  0xc9   :  { %645 = vmatmul.bf16.vlgmr.msrb.gmra.mxu3 %v534_v18  ;;  %658 = vmatmul.bf16.vlgmr.msra.gmra.mxu2 %v534_v18 }
 0x14c   :  { %v646_v26 = vpop.f32.mrf.mxu3  ;;  %v659_v27 = vpop.f32.mrf.mxu2 }
 0x14d   :  { %v647_v28 = vadd.f32 %v646_v26, %v553_v24  ;;  %v660_v29 = vadd.f32 %v659_v27, %v554_v25 }
 0x14f   :  { %v663_v30 = vmax.f32 %v647_v28, 0.0  ;;  %v664_v31 = vmax.f32 %v660_v29, 0.0 }
 0x151   :  { %v665_v32 = vpack.c.bf16 %v663_v30, %v663_v30  ;;  %v666_v33 = vpack.c.bf16 %v664_v31, %v664_v31 }
 0x153   :  { %807 = vmatmul.bf16.vlgmr.msra.gmra.mxu0 %v665_v32  ;;  %820 = vmatmul.bf16.vlgmr.msra.gmra.mxu1 %v666_v33 }
 0x154   :  { %v648_v34 = vpop.f32.mrf.mxu3  ;;  %v661_v35 = vpop.f32.mrf.mxu2 }
 0x1d0   :  { %v808_v37 = vpop.f32.mrf.mxu0  ;;  %v821_v38 = vpop.f32.mrf.mxu1 }
 0x1d1   :  { %v809_v39 = vadd.f32 %v1272_v36, %v808_v37 }
 0x1d3   :  { %v822_v40 = vadd.f32 %v821_v38, %v809_v39 }
 0x1d5   :  { %825 = vmax.xlane.f32.xlu0 %v822_v40 }
 0x1d8   :  { %v810_v41 = vpop.f32.mrf.mxu0  ;;  %v823_v42 = vpop.f32.mrf.mxu1 }
 0x248   :  { %v826_v43 = vpop.xlane.xlu0 %825 }
 0x249   :  { %v827_v44 = vsub.f32 %v822_v40, %v826_v43 }
 0x24b   :  { %v828_v45 = vmul.f32 1.442695, %v827_v44 }
 0x24d   :  { %1273 = vpow2.f32 %v828_v45 }
 0x253   :  { %v1274_v46 = vpop.eup %1273 }
 0x254   :  { %830 = vadd.xlane.f32.xlu0 %v1274_v46 }
 0x2c7   :  { %v831_v47 = vpop.xlane.xlu0 %830 }
 0x2c8   :  { %1275 = vrcp.f32 %v831_v47  ;;  %v843_v51 = vand.u32 2147483648, %v831_v47  ;;  %v841_v53 = vand.u32 2147483647, %v831_v47  ;;  %vm837_vm2 = vweird.f32 %v831_v47 }
 0x2ca   :  { %v844_v55 = vor.u32 1.1754944e-38, %v843_v51  ;;  %vm842_vm4 = vcmp.eq.f32.partialorder %v841_v53, 8.507059e+37 }
 0x2ce   :  { %v1276_v48 = vpop.eup %1275 }
 0x2cf   :  { %v833_v49 = vmul.f32 %v1276_v48, %v831_v47  ;;  %vm838_vm1 = vweird.f32 %v1276_v48 }
 0x2d0   :  { %vm839_vm3 = vmor %vm837_vm2, %vm838_vm1 }
 0x2d1   :  { %v834_v50 = vsub.f32 1.0, %v833_v49 }
 0x2d3   :  { %v835_v52 = vmul.f32 %v1276_v48, %v834_v50 }
 0x2d5   :  { %v836_v54 = vadd.f32 %v1276_v48, %v835_v52 }
 0x2d7   :  { %v840_v56 = vsel %vm839_vm3, %v1276_v48, %v836_v54 }
 0x2d8   :  { %v845_v57 = vsel %vm842_vm4, %v844_v55, %v840_v56 }
 0x2d9   :  { %v846_v58 = vmul.f32 %v1274_v46, %v845_v57 }
 0x2db   :  { %847 = vst [vmem:[#allocation2] sm:$0xff] %v846_v58 }
 0x2dc   :  { %858 = dma.vmem_to_hbm [thread:$0]  %s854_s6, 128, %s856_s21, [#allocation3]  }
 0x2dd   :  { %1301 = dma.done.wait [#allocation3], 128  }
 0x2de   :  { %1302 = vsyncadd [#allocation3], 4294967168 }
 0x2df   :  { %863 = vsyncpa [#allocation3], 1 }

</bundles_post_ra>
